<compile_context>
chip_gen: v7x
topology: tpu7x:2x2x1
jax: 0.10.0
libtpu: 0.0.40
codegen_flags: <defaults>
</compile_context>

<pallas_src>
import jax
import jax.numpy as jnp
from jax.experimental import pallas as pl
from jax.experimental.pallas import tpu as pltpu


def _make_kernel(TB, L, D, N_pad, K, P):
    L_pad = L + 2 * P
    T_out = L_pad - K + 1          # conv output length (stride 1)

    def kernel(x_ref, w_ref, b_ref, o_ref):
        # x_ref: (TB, L, D) bf16   w_ref: (K, D, N_pad) bf16
        # b_ref: (1, N_pad) f32    o_ref: (TB, N_pad) f32
        x = x_ref[...].astype(jnp.float32)                  # layout ops in f32
        if P > 0:
            zp = jnp.zeros((TB, P, D), jnp.float32)
            xp = jnp.concatenate([zp, x, zp], axis=1)       # (TB, L_pad, D)
        else:
            xp = x

        acc = jnp.zeros((TB, T_out, N_pad), jnp.float32)
        for k in range(K):                                   # static unroll, K=3
            xk = xp[:, k:k + T_out, :].astype(jnp.bfloat16)  # (TB, T_out, D)
            wk = jnp.broadcast_to(w_ref[k][None], (TB, D, N_pad))
            acc = acc + jnp.einsum(
                'btd,bdn->btn', xk, wk,
                preferred_element_type=jnp.float32)

        m = jnp.max(acc, axis=1)                             # (TB, N_pad) time max
        # bias + ReLU after the time max: max_t relu(a_t + b) == relu(max_t a_t + b)
        o_ref[...] = jnp.maximum(m + b_ref[...], 0.0).astype(o_ref.dtype)

    return kernel


def news_encoder_forward(input_ids, emb_weight, conv_w, conv_b, window_size,
                         *, block_b=8):
    """input_ids: (B, L) int32; emb_weight: (V, D); conv_w: (N, D, K); conv_b: (N,)"""
    B, L = input_ids.shape
    V, D = emb_weight.shape
    N, _, K = conv_w.shape
    P = int(window_size)

    LANE = 128
    N_pad = ((N + LANE - 1) // LANE) * LANE     # lane-dense output tile
    TB = block_b                                 # batch rows per grid step (>= 8)
    B_pad = ((B + TB - 1) // TB) * TB

    # --- glue (plain JAX): embedding gather, bf16 cast, batch padding ---
    emb = jnp.take(emb_weight, input_ids, axis=0).astype(jnp.bfloat16)   # (B, L, D)
    if B_pad != B:
        emb = jnp.pad(emb, ((0, B_pad - B), (0, 0), (0, 0)))

    # Conv1d weight (N, D, K) -> (K, D, N_pad): each tap is a (D, N_pad) matmul.
    w = jnp.transpose(conv_w, (2, 1, 0))                                 # (K, D, N)
    w = jnp.pad(w, ((0, 0), (0, 0), (0, N_pad - N))).astype(jnp.bfloat16)
    b = jnp.pad(conv_b, (0, N_pad - N)).reshape(1, N_pad).astype(jnp.float32)

    kernel = _make_kernel(TB, L, D, N_pad, K, P)

    out = pl.pallas_call(
        kernel,
        out_shape=jax.ShapeDtypeStruct((B_pad, N_pad), jnp.float32),
        grid_spec=pltpu.PrefetchScalarGridSpec(
            num_scalar_prefetch=0,
            grid=(B_pad // TB,),
            in_specs=[
                pl.BlockSpec((TB, L, D), lambda i: (i, 0, 0)),
                pl.BlockSpec((K, D, N_pad), lambda i: (0, 0, 0)),
                pl.BlockSpec((1, N_pad), lambda i: (0, 0)),
            ],
            out_specs=pl.BlockSpec((TB, N_pad), lambda i: (i, 0)),
        ),
        compiler_params=pltpu.CompilerParams(
            dimension_semantics=("parallel",)),
    )(emb, w, b)

    # strip batch / channel padding
    return out[:B, :N]


def reference_forward(input_ids, emb_weight, conv_w, conv_b, window_size):
    """Pure-JAX f32 reference matching the PyTorch semantics exactly."""
    emb = jnp.take(emb_weight, input_ids, axis=0)                  # (B, L, D)
    P = window_size
    x_pad = jnp.pad(emb, ((0, 0), (P, P), (0, 0)))                 # (B, L+2P, D)
    B, L_pad, D = x_pad.shape
    N, _, K = conv_w.shape
    T_out = L_pad - K + 1
    acc = jnp.zeros((B, T_out, N), jnp.float32)
    for k in range(K):
        acc = acc + jnp.einsum('btd,nd->btn',
                               x_pad[:, k:k + T_out, :], conv_w[:, :, k])
    acc = acc + conv_b[None, None, :]
    acc = jnp.maximum(acc, 0.0)
    return jnp.max(acc, axis=1)                                    # (B, N)


if __name__ == "__main__":
    # Small shapes consistent with the module's forward.
    B, L = 2, 8            # batch, sequence length (token ids)
    vector_dim = 32        # embedding dim (Conv1d in_channels)
    news_dim = 32          # Conv1d out_channels
    window_size = 3        # conv padding
    vocab_size = 50        # len(vocab); embedding table has vocab_size + 2 rows

    key = jax.random.PRNGKey(0)
    k_ids, k_emb, k_w, k_b = jax.random.split(key, 4)

    input_ids = jax.random.randint(
        k_ids, (B, L), minval=0, maxval=vocab_size + 2, dtype=jnp.int32)

    emb_weight = jax.random.normal(
        k_emb, (vocab_size + 2, vector_dim), dtype=jnp.float32) * 0.1
    # padding_idx=0 -> row 0 is zeros
    emb_weight = emb_weight.at[0].set(0.0)

    conv_w = jax.random.normal(
        k_w, (news_dim, vector_dim, 3), dtype=jnp.float32) * 0.1
    conv_b = jax.random.normal(k_b, (news_dim,), dtype=jnp.float32) * 0.1

    out = news_encoder_forward(input_ids, emb_weight, conv_w, conv_b, window_size)
    out = jax.block_until_ready(out)

    ref = reference_forward(input_ids, emb_weight, conv_w, conv_b, window_size)
    assert out.shape == (B, news_dim)
    # bf16 activations/weights with f32 accumulation -> tolerance covers the cast
    assert jnp.allclose(out, ref, atol=1e-2, rtol=1e-2), "mismatch vs reference"

    print("KERNEL_OK")
</pallas_src>

<mosaic_0001>
module attributes {stable_mosaic.version = 11 : i64} {
  func.func @kernel(%arg0: i32, %arg1: memref<8x8x32xbf16, #tpu.memory_space<vmem>>, %arg2: memref<3x32x128xbf16, #tpu.memory_space<vmem>>, %arg3: memref<1x128xf32, #tpu.memory_space<vmem>>, %arg4: memref<8x128xf32, #tpu.memory_space<vmem>>) attributes {dimension_semantics = [#tpu.dimension_semantics<parallel>], iteration_bounds = array<i64: 1>, scalar_prefetch = 0 : i64, scratch_operands = 0 : i64, tpu.core_type = #tpu.core_type<tc>, window_params = [{transform_indices = @transform_0, window_bounds = array<i64: 8, 8, 32>}, {pipeline_mode = #tpu.pipeline_mode<synchronous>, transform_indices = @transform_1, window_bounds = array<i64: 3, 32, 128>}, {pipeline_mode = #tpu.pipeline_mode<synchronous>, transform_indices = @transform_2, window_bounds = array<i64: 1, 128>}, {transform_indices = @transform_3, window_bounds = array<i64: 8, 128>}]} {
    %c0 = arith.constant 0 : index
    %c0_0 = arith.constant 0 : index
    %c0_1 = arith.constant 0 : index
    %0 = vector.load %arg1[%c0, %c0_0, %c0_1] : memref<8x8x32xbf16, #tpu.memory_space<vmem>>, vector<8x8x32xbf16>
    %1 = arith.extf %0 : vector<8x8x32xbf16> to vector<8x8x32xf32>
    %cst = arith.constant 0.000000e+00 : f32
    %2 = vector.broadcast %cst : f32 to vector<8x3x32xf32>
    %3 = tpu.concatenate %2, %1, %2 in 1 : vector<8x3x32xf32>, vector<8x8x32xf32>, vector<8x3x32xf32> -> vector<8x14x32xf32>
    %cst_2 = arith.constant 0.000000e+00 : f32
    %4 = vector.broadcast %cst_2 : f32 to vector<8x12x128xf32>
    %5 = vector.extract_strided_slice %3 {offsets = [0, 0, 0], sizes = [8, 12, 32], strides = [1, 1, 1]} : vector<8x14x32xf32> to vector<8x12x32xf32>
    %6 = arith.truncf %5 : vector<8x12x32xf32> to vector<8x12x32xbf16>
    %c0_3 = arith.constant 0 : index
    %c0_4 = arith.constant 0 : index
    %c0_5 = arith.constant 0 : index
    %7 = vector.load %arg2[%c0_3, %c0_4, %c0_5] : memref<3x32x128xbf16, #tpu.memory_space<vmem>>, vector<1x32x128xbf16>
    %8 = vector.shape_cast %7 : vector<1x32x128xbf16> to vector<32x128xbf16>
    %9 = vector.shape_cast %8 : vector<32x128xbf16> to vector<1x32x128xbf16>
    %10 = vector.shape_cast %9 : vector<1x32x128xbf16> to vector<1x32x128xbf16>
    %11 = vector.broadcast %10 : vector<1x32x128xbf16> to vector<8x32x128xbf16>
    "tpu.trace_start"() <{level = 10 : i32, message = "btd,bdn->btn"}> : () -> ()
    %cst_6 = arith.constant dense<0.000000e+00> : vector<8x12x128xf32>
    %12 = tpu.matmul %6, %11, %cst_6 {dimension_numbers = #tpu.dot_dimension_numbers<[2], [1], [1], [2], [0, 0, 0, 1, 1, 2], [0], [0]>} : vector<8x12x32xbf16>, vector<8x32x128xbf16>, vector<8x12x128xf32> -> vector<8x12x128xf32>
    "tpu.trace_stop"() : () -> ()
    %13 = arith.addf %4, %12 : vector<8x12x128xf32>
    %14 = vector.extract_strided_slice %3 {offsets = [0, 1, 0], sizes = [8, 12, 32], strides = [1, 1, 1]} : vector<8x14x32xf32> to vector<8x12x32xf32>
    %15 = arith.truncf %14 : vector<8x12x32xf32> to vector<8x12x32xbf16>
    %c1 = arith.constant 1 : index
    %c0_7 = arith.constant 0 : index
    %c0_8 = arith.constant 0 : index
    %16 = vector.load %arg2[%c1, %c0_7, %c0_8] : memref<3x32x128xbf16, #tpu.memory_space<vmem>>, vector<1x32x128xbf16>
    %17 = vector.shape_cast %16 : vector<1x32x128xbf16> to vector<32x128xbf16>
    %18 = vector.shape_cast %17 : vector<32x128xbf16> to vector<1x32x128xbf16>
    %19 = vector.shape_cast %18 : vector<1x32x128xbf16> to vector<1x32x128xbf16>
    %20 = vector.broadcast %19 : vector<1x32x128xbf16> to vector<8x32x128xbf16>
    "tpu.trace_start"() <{level = 10 : i32, message = "btd,bdn->btn"}> : () -> ()
    %cst_9 = arith.constant dense<0.000000e+00> : vector<8x12x128xf32>
    %21 = tpu.matmul %15, %20, %cst_9 {dimension_numbers = #tpu.dot_dimension_numbers<[2], [1], [1], [2], [0, 0, 0, 1, 1, 2], [0], [0]>} : vector<8x12x32xbf16>, vector<8x32x128xbf16>, vector<8x12x128xf32> -> vector<8x12x128xf32>
    "tpu.trace_stop"() : () -> ()
    %22 = arith.addf %13, %21 : vector<8x12x128xf32>
    %23 = vector.extract_strided_slice %3 {offsets = [0, 2, 0], sizes = [8, 12, 32], strides = [1, 1, 1]} : vector<8x14x32xf32> to vector<8x12x32xf32>
    %24 = arith.truncf %23 : vector<8x12x32xf32> to vector<8x12x32xbf16>
    %c2 = arith.constant 2 : index
    %c0_10 = arith.constant 0 : index
    %c0_11 = arith.constant 0 : index
    %25 = vector.load %arg2[%c2, %c0_10, %c0_11] : memref<3x32x128xbf16, #tpu.memory_space<vmem>>, vector<1x32x128xbf16>
    %26 = vector.shape_cast %25 : vector<1x32x128xbf16> to vector<32x128xbf16>
    %27 = vector.shape_cast %26 : vector<32x128xbf16> to vector<1x32x128xbf16>
    %28 = vector.shape_cast %27 : vector<1x32x128xbf16> to vector<1x32x128xbf16>
    %29 = vector.broadcast %28 : vector<1x32x128xbf16> to vector<8x32x128xbf16>
    "tpu.trace_start"() <{level = 10 : i32, message = "btd,bdn->btn"}> : () -> ()
    %cst_12 = arith.constant dense<0.000000e+00> : vector<8x12x128xf32>
    %30 = tpu.matmul %24, %29, %cst_12 {dimension_numbers = #tpu.dot_dimension_numbers<[2], [1], [1], [2], [0, 0, 0, 1, 1, 2], [0], [0]>} : vector<8x12x32xbf16>, vector<8x32x128xbf16>, vector<8x12x128xf32> -> vector<8x12x128xf32>
    "tpu.trace_stop"() : () -> ()
    %31 = arith.addf %22, %30 : vector<8x12x128xf32>
    %cst_13 = arith.constant dense<0xFF800000> : vector<8x128xf32>
    %32 = vector.multi_reduction <maximumf>, %31, %cst_13 [1] : vector<8x12x128xf32> to vector<8x128xf32>
    %c0_14 = arith.constant 0 : index
    %c0_15 = arith.constant 0 : index
    %33 = vector.load %arg3[%c0_14, %c0_15] : memref<1x128xf32, #tpu.memory_space<vmem>>, vector<1x128xf32>
    %34 = vector.broadcast %33 : vector<1x128xf32> to vector<8x128xf32>
    %35 = arith.addf %32, %34 : vector<8x128xf32>
    %cst_16 = arith.constant 0.000000e+00 : f32
    %36 = vector.broadcast %cst_16 : f32 to vector<8x128xf32>
    %37 = arith.maximumf %35, %36 : vector<8x128xf32>
    %c0_17 = arith.constant 0 : index
    %c0_18 = arith.constant 0 : index
    %38 = vector.load %arg4[%c0_17, %c0_18] : memref<8x128xf32, #tpu.memory_space<vmem>>, vector<8x128xf32>
    tpu.vector_store %arg4[%c0_17, %c0_18], %37 {strides = array<i32>} : memref<8x128xf32, #tpu.memory_space<vmem>>, vector<8x128xf32>,
    return
  }
  func.func @transform_0(%arg0: i32) -> (i32, i32, i32) {
    %c0_i32 = arith.constant 0 : i32
    %c0_i32_0 = arith.constant 0 : i32
    %c0_i32_1 = arith.constant 0 : i32
    return %arg0, %c0_i32, %c0_i32_0 : i32, i32, i32
  }
  func.func @transform_1(%arg0: i32) -> (i32, i32, i32) {
    %c0_i32 = arith.constant 0 : i32
    %c0_i32_0 = arith.constant 0 : i32
    %c0_i32_1 = arith.constant 0 : i32
    %c0_i32_2 = arith.constant 0 : i32
    return %c0_i32, %c0_i32_0, %c0_i32_1 : i32, i32, i32
  }
  func.func @transform_2(%arg0: i32) -> (i32, i32) {
    %c0_i32 = arith.constant 0 : i32
    %c0_i32_0 = arith.constant 0 : i32
    %c0_i32_1 = arith.constant 0 : i32
    return %c0_i32, %c0_i32_0 : i32, i32
  }
  func.func @transform_3(%arg0: i32) -> (i32, i32) {
    %c0_i32 = arith.constant 0 : i32
    %c0_i32_0 = arith.constant 0 : i32
    return %arg0, %c0_i32 : i32, i32
  }
}

</mosaic_0001>

<bundles_post_ra>
// kernel: tpu_custom_call.1
= control target key start
LH: loop header
LB: loop body
LE: loop exit
PB: predicated region body
PF: predicated region fallthrough
CT: control target
= control target key end

     0   :  { %8 = vsyncpa [#allocation3], 0  ;;  %s2182_s0 = inlined_call_operand.hbm [shape: bf16[8,8,32], index: 0, kind: input, shape index: {}]   ;;  %s2183_s1 = inlined_call_operand.hbm [shape: bf16[3,32,128], index: 1, kind: input, shape index: {}]   ;;  %s2184_s2 = inlined_call_operand.vmem [shape: f32[1,128], index: 2, kind: input, shape index: {}]   ;;  %s2185_s3 = inlined_call_operand.hbm [shape: f32[8,128], index: 3, kind: output, shape index: {}]  }
   0x1   :  { %9 = vsyncpa [#allocation6], 0 }
   0x2   :  { %10 = vsyncpa [#allocation4], 0  ;;  %s1894_s12 = smov [#allocation2]   ;;  %s1822_s16 = scalar_lea.hbm %s2182_s0, 512 }
   0x3   :  { %s16_s13 = sshll.u32 %s1894_s12, 4  ;;  %p1823_p0 = scmp.ne.s32.totalorder %s2182_s0, %s1822_s16  ;;  %s17_s13 = int_to_ptr.vmem [resolvable:$true] %s16_s13 }
   0x4   :  { %p1826_p1 = scmp.lt.u32.totalorder %s1822_s16, %s2182_s0 }
   0x6   :  { %p1828_p2 = pnand %p1826_p1, %p1823_p0 }
   0x8   :  { %1831 = shalt.err (!%p1828_p2)
}
   0x9   :  { %s1832_s21 = scalar_lea.vmem %s17_s13, 512  ;;  %p1837_p4 = scmp.lt.s32.totalorder %s17_s13, %s17_s13 }
   0xa   :  { %p1833_p3 = scmp.ne.s32.totalorder %s17_s13, %s1832_s21  ;;  %p1838_p5 = scmp.lt.s32.totalorder %s1832_s21, %s1832_s21 }
   0xc   :  { %p1839_p6 = por %p1838_p5, %p1837_p4 }
   0xe   :  { %p1840_p7 = pnand %p1839_p6, %p1833_p3 }
  0x10   :  { %1843 = shalt.err (!%p1840_p7)
}
  0x11   :  { %s1895_s22 = smov 64   ;;  %s1896_s23 = smov 4  }
  0x12   :  { %22 = dma.hbm_to_vmem [thread:$0]  %s2182_s0, 512, %s17_s13, [#allocation3], %s1895_s22, %s1895_s22, %s1896_s23  }
  0x13   :  { %s1897_s26 = smov [#allocation5]   ;;  %s1844_s30 = scalar_lea.hbm %s2183_s1, 768 }
  0x14   :  { %s28_s27 = sshll.u32 %s1897_s26, 4  ;;  %p1845_p8 = scmp.ne.s32.totalorder %s2183_s1, %s1844_s30  ;;  %s29_s27 = int_to_ptr.vmem [resolvable:$true] %s28_s27 }
  0x15   :  { %p1848_p9 = scmp.lt.u32.totalorder %s1844_s30, %s2183_s1 }
  0x17   :  { %p1850_p10 = pnand %p1848_p9, %p1845_p8 }
  0x19   :  { %1853 = shalt.err (!%p1850_p10)
}
  0x1a   :  { %s1854_s8 = scalar_lea.vmem %s29_s27, 768  ;;  %p1859_p12 = scmp.lt.s32.totalorder %s29_s27, %s29_s27 }
  0x1b   :  { %p1855_p11 = scmp.ne.s32.totalorder %s29_s27, %s1854_s8  ;;  %p1860_p13 = scmp.lt.s32.totalorder %s1854_s8, %s1854_s8 }
  0x1d   :  { %p1861_p0 = por %p1860_p13, %p1859_p12 }
  0x1f   :  { %p1862_p1 = pnand %p1861_p0, %p1855_p11 }
  0x21   :  { %1865 = shalt.err (!%p1862_p1)
}
  0x22   :  { %34 = dma.hbm_to_vmem [thread:$0]  %s2183_s1, 768, %s29_s27, [#allocation6], %s1895_s22, %s1895_s22, %s1896_s23  }
  0x23   :  { %1888 = dma.done.wait [#allocation3], 512  }
  0x24   :  { %1889 = vsyncadd [#allocation3], 4294966784 }
  0x25   :  { %1890 = dma.done.wait [#allocation6], 768  }
  0x26   :  { %1891 = vsyncadd [#allocation6], 4294966528  ;;  %v1898_v0 = vmov 0.0   ;;  %vm1899_vm0 = vmmov 0   ;;  %v1951_v1 = vld [vmem:[#allocation5 + $0x10] sm:$0xff]   ;;  %v1953_v2 = vld [vmem:[#allocation5 + $0x18] sm:$0xff]  }
  0x27   :  { %1553 = vmatprep.subr.bf16.mxu0 %v1898_v0  ;;  %1561 = vmatprep.subr.bf16.mxu1 %v1898_v0  ;;  %v1463_v3 = vld [vmem:[#allocation2] sm:$0xff]   ;;  %v1478_v4 = vld [vmem:[#allocation2 + $0x8] sm:$0xff]   ;;  %v1479_v5 = vld [vmem:[#allocation2 + $0x10] sm:$0xff]   ;;  %vm84_vm1 = vcmask 1042432   ;;  %vm137_vm2 = vcmask 261120   ;;  %vm1296_vm3 = vcmask 1043456  }
  0x28   :  { %1557 = vmatprep.mubr.msk.bf16.mxu0 %vm1899_vm0, %v1898_v0  ;;  %1565 = vmatprep.mubr.msk.bf16.mxu1 %vm1899_vm0, %v1898_v0  ;;  %v1464_v6 = vunpack.c.l.bf16 %v1463_v3  ;;  %v1465_v7 = vunpack.c.h.bf16 %v1463_v3  ;;  %v1468_v8 = vunpack.c.l.bf16 %v1478_v4  ;;  %v1469_v9 = vunpack.c.h.bf16 %v1478_v4  ;;  %v1480_v17 = vld [vmem:[#allocation2 + $0x18] sm:$0xff]  }
  0x29   :  { %1554 = vmatpush3.bf16.msra.mxu0 %v1951_v1  ;;  %1562 = vmatpush3.bf16.msra.mxu1 %v1951_v1  ;;  %v1472_v10 = vunpack.c.l.bf16 %v1479_v5  ;;  %v1473_v11 = vunpack.c.h.bf16 %v1479_v5  ;;  %v1476_v36 = vunpack.c.l.bf16 %v1480_v17  ;;  %v1477_v44 = vunpack.c.h.bf16 %v1480_v17 }
  0x2a   :  { %1555 = vmatprep.subr.bf16.mxu0 %v1898_v0  ;;  %1563 = vmatprep.subr.bf16.mxu1 %v1898_v0  ;;  %v68_v12 = vrot.slane %v1464_v6, 5  ;;  %v69_v13 = vrot.slane %v1465_v7, 5  ;;  %v70_v14 = vrot.slane %v1468_v8, 5  ;;  %v71_v15 = vrot.slane %v1469_v9, 5 }
  0x2b   :  { %v72_v16 = vrot.slane %v1472_v10, 5  ;;  %v73_v29 = vrot.slane %v1473_v11, 5  ;;  %v74_v53 = vrot.slane %v1476_v36, 5  ;;  %v75_v54 = vrot.slane %v1477_v44, 5 }
  0x2c   :  { %v85_v18 = vsel %vm84_vm1, 0.0, %v68_v12  ;;  %v93_v19 = vsel %vm84_vm1, %v68_v12, 0.0  ;;  %v86_v20 = vsel %vm84_vm1, 0.0, %v69_v13  ;;  %v94_v21 = vsel %vm84_vm1, %v69_v13, 0.0 }
  0x2d   :  { %1556 = vmatpush3.bf16.msra.mxu0 %v1953_v2  ;;  %1564 = vmatpush3.bf16.msra.mxu1 %v1953_v2  ;;  %v1967_v22 = vpack.c.bf16 %v93_v19, %v85_v18  ;;  %v1969_v23 = vpack.c.bf16 %v94_v21, %v86_v20  ;;  %v87_v24 = vsel %vm84_vm1, 0.0, %v70_v14  ;;  %v95_v25 = vsel %vm84_vm1, %v70_v14, 0.0  ;;  %v1818_v18 = vld [vmem:[#allocation5] sm:$0xff]   ;;  %v1821_v19 = vld [vmem:[#allocation5 + $0x28] sm:$0xff]  }
  0x2e   :  { %1569 = vmatprep.subr.bf16.mxu0 %v1898_v0  ;;  %1577 = vmatprep.subr.bf16.mxu1 %v1898_v0  ;;  %v1973_v26 = vpack.c.bf16 %v95_v25, %v87_v24  ;;  %v88_v27 = vsel %vm84_vm1, 0.0, %v71_v15  ;;  %v96_v28 = vsel %vm84_vm1, %v71_v15, 0.0  ;;  %v89_v35 = vsel %vm84_vm1, 0.0, %v72_v16 }
  0x2f   :  { %v119_v30 = vshrl.u32 %v1967_v22, 16  ;;  %v121_v31 = vshll.u32 %v1967_v22, 16  ;;  %v183_v32 = vshrl.u32 %v1969_v23, 16  ;;  %v185_v33 = vshll.u32 %v1969_v23, 16 }
  0x30   :  { %v1981_v34 = vpack.c.bf16 %v96_v28, %v88_v27  ;;  %v236_v39 = vshll.u32 %v1973_v26, 16  ;;  %v97_v40 = vsel %vm84_vm1, %v72_v16, 0.0  ;;  %v90_v42 = vsel %vm84_vm1, 0.0, %v73_v29 }
  0x31   :  { %v123_v37 = vrot.slane %v121_v31, 1  ;;  %v187_v38 = vrot.slane %v185_v33, 1  ;;  %v98_v43 = vsel %vm84_vm1, %v73_v29, 0.0  ;;  %v234_v47 = vshrl.u32 %v1973_v26, 16 }
  0x32   :  { %v287_v41 = vshll.u32 %v1981_v34, 16  ;;  %v1990_v48 = vpack.c.bf16 %v97_v40, %v89_v35  ;;  %v238_v49 = vrot.slane %v236_v39, 1  ;;  %v285_v50 = vshrl.u32 %v1981_v34, 16 }
  0x33   :  { %v124_v45 = vor.u32 %v123_v37, %v119_v30  ;;  %v188_v46 = vor.u32 %v187_v38, %v183_v32  ;;  %v1995_v52 = vpack.c.bf16 %v98_v43, %v90_v42  ;;  %v91_v59 = vsel %vm84_vm1, 0.0, %v74_v53 }
  0x34   :  { %v289_v51 = vrot.slane %v287_v41, 1  ;;  %v338_v55 = vshll.u32 %v1990_v48, 16  ;;  %v239_v56 = vor.u32 %v238_v49, %v234_v47  ;;  %v99_v60 = vsel %vm84_vm1, %v74_v53, 0.0 }
  0x35   :  { %1558 = vmatmul.mubr.msk.bf16.vlgmr.msra.gmra.mrb[0].mxu0 %vm137_vm2, %v124_v45  ;;  %1566 = vmatmul.mubr.msk.bf16.vlgmr.msra.gmra.mrb[0].mxu1 %vm137_vm2, %v188_v46  ;;  %v389_v58 = vshll.u32 %v1995_v52, 16  ;;  %v92_v61 = vsel %vm84_vm1, 0.0, %v75_v54  ;;  %v100_v62 = vsel %vm84_vm1, %v75_v54, 0.0  ;;  %v336_v63 = vshrl.u32 %v1990_v48, 16 }
  0x36   :  { %1570 = vmatpush3.bf16.msra.mxu0 %v1951_v1  ;;  %1578 = vmatpush3.bf16.msra.mxu1 %v1951_v1  ;;  %v290_v57 = vor.u32 %v289_v51, %v285_v50  ;;  %v340_v3 = vrot.slane %v338_v55, 1  ;;  %v387_v4 = vshrl.u32 %v1995_v52, 16  ;;  %v2019_v6 = vpack.c.bf16 %v99_v60, %v91_v59 }
  0x37   :  { %1571 = vmatprep.subr.bf16.mxu0 %v1898_v0  ;;  %1579 = vmatprep.subr.bf16.mxu1 %v1898_v0  ;;  %v391_v5 = vrot.slane %v389_v58, 1  ;;  %v2021_v7 = vpack.c.bf16 %v100_v62, %v92_v61  ;;  %v901_v20 = vrot.slane %v1967_v22, 1  ;;  %v959_v21 = vrot.slane %v1969_v23, 1 }
  0x38   :  { %1573 = vmatprep.mubr.msk.bf16.mxu0 %vm1899_vm0, %v1898_v0  ;;  %1581 = vmatprep.mubr.msk.bf16.mxu1 %vm1899_vm0, %v1898_v0  ;;  %v341_v8 = vor.u32 %v340_v3, %v336_v63  ;;  %v440_v10 = vshll.u32 %v2019_v6, 16  ;;  %v438_v12 = vshrl.u32 %v2019_v6, 16  ;;  %v1097_v24 = vrot.slane %v1990_v48, 1  ;;  %v2156_v63 = vld [vmem:[%s2184_s2] ss:$0 sm:$0xff]  ;;  %s1900_s2 = smov [#allocation7]  }
  0x39   :  { %v392_v9 = vor.u32 %v391_v5, %v387_v4  ;;  %v491_v11 = vshll.u32 %v2021_v7, 16  ;;  %v489_v14 = vshrl.u32 %v2021_v7, 16  ;;  %v1143_v25 = vrot.slane %v1995_v52, 1  ;;  %s1421_s11 = sshll.u32 %s1900_s2, 4  ;;  %s1422_s11 = int_to_ptr.vmem [resolvable:$true] %s1421_s11 }
  0x3a   :  { %1572 = vmatpush3.bf16.msra.mxu0 %v1953_v2  ;;  %1580 = vmatpush3.bf16.msra.mxu1 %v1953_v2  ;;  %v442_v13 = vrot.slane %v440_v10, 1  ;;  %v1235_v27 = vrot.slane %v2021_v7, 1  ;;  %vm1393_vm4 = vcmask 1041409   ;;  %vm1396_vm5 = vcmask 1042434   ;;  %s1866_s12 = scalar_lea.vmem %s1422_s11, 128  ;;  %p1871_p3 = scmp.lt.s32.totalorder %s1422_s11, %s1422_s11 }
  0x3b   :  { %1585 = vmatprep.subr.bf16.mxu0 %v1898_v0  ;;  %1593 = vmatprep.subr.bf16.mxu1 %v1898_v0  ;;  %v493_v15 = vrot.slane %v491_v11, 1  ;;  %vm1399_vm6 = vcmask 1043459   ;;  %vm1402_vm7 = vcmask 1044484   ;;  %vm1405_vm8 = vcmask 1045509   ;;  %p1867_p2 = scmp.ne.s32.totalorder %s1422_s11, %s1866_s12  ;;  %p1872_p4 = scmp.lt.s32.totalorder %s1866_s12, %s1866_s12 }
  0x3c   :  { %v443_v16 = vor.u32 %v442_v13, %v438_v12  ;;  %vm1408_vm9 = vcmask 1046534   ;;  %vm1411_vm10 = vcmask 1047559  }
  0x3d   :  { %1574 = vmatmul.mubr.msk.bf16.vlgmr.msra.gmra.mrb[4].mxu0 %vm137_vm2, %v239_v56  ;;  %1582 = vmatmul.mubr.msk.bf16.vlgmr.msra.gmra.mrb[4].mxu1 %vm137_vm2, %v290_v57  ;;  %v494_v17 = vor.u32 %v493_v15, %v489_v14  ;;  %p1873_p5 = por %p1872_p4, %p1871_p3 }
  0x3e   :  { %1586 = vmatpush3.bf16.msra.mxu0 %v1951_v1  ;;  %1594 = vmatpush3.bf16.msra.mxu1 %v1951_v1 }
  0x3f   :  { %1587 = vmatprep.subr.bf16.mxu0 %v1898_v0  ;;  %1595 = vmatprep.subr.bf16.mxu1 %v1898_v0  ;;  %p1874_p6 = pnand %p1873_p5, %p1867_p2 }
  0x40   :  { %1589 = vmatprep.mubr.msk.bf16.mxu0 %vm1899_vm0, %v1898_v0  ;;  %1597 = vmatprep.mubr.msk.bf16.mxu1 %vm1899_vm0, %v1898_v0 }
  0x42   :  { %1588 = vmatpush3.bf16.msra.mxu0 %v1953_v2  ;;  %1596 = vmatpush3.bf16.msra.mxu1 %v1953_v2 }
  0x43   :  { %1601 = vmatprep.subr.bf16.mxu0 %v1898_v0  ;;  %1609 = vmatprep.subr.bf16.mxu1 %v1898_v0 }
  0x45   :  { %1590 = vmatmul.mubr.msk.bf16.vlgmr.msra.gmra.mrb[8].mxu0 %vm137_vm2, %v341_v8  ;;  %1598 = vmatmul.mubr.msk.bf16.vlgmr.msra.gmra.mrb[8].mxu1 %vm137_vm2, %v392_v9 }
  0x46   :  { %1602 = vmatpush3.bf16.msra.mxu0 %v1951_v1  ;;  %1610 = vmatpush3.bf16.msra.mxu1 %v1951_v1  ;;  %v1819_v1 = vld [vmem:[#allocation5 + $0x8] sm:$0xff]  }
  0x47   :  { %1603 = vmatprep.subr.bf16.mxu0 %v1898_v0  ;;  %1611 = vmatprep.subr.bf16.mxu1 %v1898_v0 }
  0x48   :  { %1605 = vmatprep.mubr.msk.bf16.mxu0 %vm1899_vm0, %v1898_v0  ;;  %1613 = vmatprep.mubr.msk.bf16.mxu1 %vm1899_vm0, %v1898_v0 }
  0x4a   :  { %1604 = vmatpush3.bf16.msra.mxu0 %v1953_v2  ;;  %1612 = vmatpush3.bf16.msra.mxu1 %v1953_v2  ;;  %v1820_v2 = vld [vmem:[#allocation5 + $0x20] sm:$0xff]  }
  0x4b   :  { %1617 = vmatprep.subr.bf16.mxu0 %v1898_v0  ;;  %1625 = vmatprep.subr.bf16.mxu1 %v1898_v0 }
  0x4d   :  { %1606 = vmatmul.mubr.msk.bf16.vlgmr.msra.gmra.mrb[12].mxu0 %vm137_vm2, %v443_v16  ;;  %1614 = vmatmul.mubr.msk.bf16.vlgmr.msra.gmra.mrb[12].mxu1 %vm137_vm2, %v494_v17 }
  0x4e   :  { %1618 = vmatpush3.bf16.msra.mxu0 %v1818_v18  ;;  %1626 = vmatpush3.bf16.msra.mxu1 %v1818_v18 }
  0x4f   :  { %1619 = vmatprep.subr.bf16.mxu0 %v1898_v0  ;;  %1627 = vmatprep.subr.bf16.mxu1 %v1898_v0 }
  0x50   :  { %1621 = vmatprep.mubr.msk.bf16.mxu0 %vm1899_vm0, %v1898_v0  ;;  %1629 = vmatprep.mubr.msk.bf16.mxu1 %vm1899_vm0, %v1898_v0 }
  0x52   :  { %1620 = vmatpush3.bf16.msra.mxu0 %v1819_v1  ;;  %1628 = vmatpush3.bf16.msra.mxu1 %v1819_v1 }
  0x53   :  { %1633 = vmatprep.subr.bf16.mxu0 %v1898_v0  ;;  %1641 = vmatprep.subr.bf16.mxu1 %v1898_v0 }
  0x55   :  { %1622 = vmatmul.mubr.msk.bf16.vlgmr.msra.gmra.mrb[0].mxu0 %vm137_vm2, %v1967_v22  ;;  %1630 = vmatmul.mubr.msk.bf16.vlgmr.msra.gmra.mrb[0].mxu1 %vm137_vm2, %v1969_v23  ;;  %v1005_v22 = vrot.slane %v1973_v26, 1  ;;  %v1051_v23 = vrot.slane %v1981_v34, 1 }
  0x56   :  { %1634 = vmatpush3.bf16.msra.mxu0 %v1818_v18  ;;  %1642 = vmatpush3.bf16.msra.mxu1 %v1818_v18 }
  0x57   :  { %1635 = vmatprep.subr.bf16.mxu0 %v1898_v0  ;;  %1643 = vmatprep.subr.bf16.mxu1 %v1898_v0 }
  0x58   :  { %1637 = vmatprep.mubr.msk.bf16.mxu0 %vm1899_vm0, %v1898_v0  ;;  %1645 = vmatprep.mubr.msk.bf16.mxu1 %vm1899_vm0, %v1898_v0 }
  0x5a   :  { %1636 = vmatpush3.bf16.msra.mxu0 %v1819_v1  ;;  %1644 = vmatpush3.bf16.msra.mxu1 %v1819_v1 }
  0x5b   :  { %1649 = vmatprep.subr.bf16.mxu0 %v1898_v0  ;;  %1657 = vmatprep.subr.bf16.mxu1 %v1898_v0 }
  0x5d   :  { %1638 = vmatmul.mubr.msk.bf16.vlgmr.msra.gmra.mrb[4].mxu0 %vm137_vm2, %v1973_v26  ;;  %1646 = vmatmul.mubr.msk.bf16.vlgmr.msra.gmra.mrb[4].mxu1 %vm137_vm2, %v1981_v34  ;;  %v1189_v26 = vrot.slane %v2019_v6, 1 }
  0x5e   :  { %1650 = vmatpush3.bf16.msra.mxu0 %v1818_v18  ;;  %1658 = vmatpush3.bf16.msra.mxu1 %v1818_v18 }
  0x5f   :  { %1651 = vmatprep.subr.bf16.mxu0 %v1898_v0  ;;  %1659 = vmatprep.subr.bf16.mxu1 %v1898_v0 }
  0x60   :  { %1653 = vmatprep.mubr.msk.bf16.mxu0 %vm1899_vm0, %v1898_v0  ;;  %1661 = vmatprep.mubr.msk.bf16.mxu1 %vm1899_vm0, %v1898_v0 }
  0x62   :  { %1652 = vmatpush3.bf16.msra.mxu0 %v1819_v1  ;;  %1660 = vmatpush3.bf16.msra.mxu1 %v1819_v1 }
  0x63   :  { %1665 = vmatprep.subr.bf16.mxu0 %v1898_v0  ;;  %1673 = vmatprep.subr.bf16.mxu1 %v1898_v0 }
  0x65   :  { %1654 = vmatmul.mubr.msk.bf16.vlgmr.msra.gmra.mrb[8].mxu0 %vm137_vm2, %v1990_v48  ;;  %1662 = vmatmul.mubr.msk.bf16.vlgmr.msra.gmra.mrb[8].mxu1 %vm137_vm2, %v1995_v52 }
  0x66   :  { %1666 = vmatpush3.bf16.msra.mxu0 %v1818_v18  ;;  %1674 = vmatpush3.bf16.msra.mxu1 %v1818_v18 }
  0x67   :  { %1667 = vmatprep.subr.bf16.mxu0 %v1898_v0  ;;  %1675 = vmatprep.subr.bf16.mxu1 %v1898_v0 }
  0x68   :  { %1669 = vmatprep.mubr.msk.bf16.mxu0 %vm1899_vm0, %v1898_v0  ;;  %1677 = vmatprep.mubr.msk.bf16.mxu1 %vm1899_vm0, %v1898_v0 }
  0x6a   :  { %1668 = vmatpush3.bf16.msra.mxu0 %v1819_v1  ;;  %1676 = vmatpush3.bf16.msra.mxu1 %v1819_v1 }
  0x6b   :  { %1681 = vmatprep.subr.bf16.mxu0 %v1898_v0  ;;  %1689 = vmatprep.subr.bf16.mxu1 %v1898_v0 }
  0x6d   :  { %1670 = vmatmul.mubr.msk.bf16.vlgmr.msra.gmra.mrb[12].mxu0 %vm137_vm2, %v2019_v6  ;;  %1678 = vmatmul.mubr.msk.bf16.vlgmr.msra.gmra.mrb[12].mxu1 %vm137_vm2, %v2021_v7 }
  0x6e   :  { %1682 = vmatpush3.bf16.msra.mxu0 %v1820_v2  ;;  %1690 = vmatpush3.bf16.msra.mxu1 %v1820_v2 }
  0x6f   :  { %1683 = vmatprep.subr.bf16.mxu0 %v1898_v0  ;;  %1691 = vmatprep.subr.bf16.mxu1 %v1898_v0 }
  0x70   :  { %1685 = vmatprep.mubr.msk.bf16.mxu0 %vm1899_vm0, %v1898_v0  ;;  %1693 = vmatprep.mubr.msk.bf16.mxu1 %vm1899_vm0, %v1898_v0 }
  0x72   :  { %1684 = vmatpush3.bf16.msra.mxu0 %v1821_v19  ;;  %1692 = vmatpush3.bf16.msra.mxu1 %v1821_v19 }
  0x73   :  { %1697 = vmatprep.subr.bf16.mxu0 %v1898_v0  ;;  %1705 = vmatprep.subr.bf16.mxu1 %v1898_v0 }
  0x75   :  { %1686 = vmatmul.mubr.msk.bf16.vlgmr.msra.gmra.mrb[0].mxu0 %vm137_vm2, %v901_v20  ;;  %1694 = vmatmul.mubr.msk.bf16.vlgmr.msra.gmra.mrb[0].mxu1 %vm137_vm2, %v959_v21 }
  0x76   :  { %1698 = vmatpush3.bf16.msra.mxu0 %v1820_v2  ;;  %1706 = vmatpush3.bf16.msra.mxu1 %v1820_v2 }
  0x77   :  { %1699 = vmatprep.subr.bf16.mxu0 %v1898_v0  ;;  %1707 = vmatprep.subr.bf16.mxu1 %v1898_v0 }
  0x78   :  { %1701 = vmatprep.mubr.msk.bf16.mxu0 %vm1899_vm0, %v1898_v0  ;;  %1709 = vmatprep.mubr.msk.bf16.mxu1 %vm1899_vm0, %v1898_v0 }
  0x7a   :  { %1700 = vmatpush3.bf16.msra.mxu0 %v1821_v19  ;;  %1708 = vmatpush3.bf16.msra.mxu1 %v1821_v19 }
  0x7b   :  { %1713 = vmatprep.subr.bf16.mxu0 %v1898_v0  ;;  %1721 = vmatprep.subr.bf16.mxu1 %v1898_v0 }
  0x7d   :  { %1702 = vmatmul.mubr.msk.bf16.vlgmr.msra.gmra.mrb[4].mxu0 %vm137_vm2, %v1005_v22  ;;  %1710 = vmatmul.mubr.msk.bf16.vlgmr.msra.gmra.mrb[4].mxu1 %vm137_vm2, %v1051_v23 }
  0x7e   :  { %1714 = vmatpush3.bf16.msra.mxu0 %v1820_v2  ;;  %1722 = vmatpush3.bf16.msra.mxu1 %v1820_v2 }
  0x7f   :  { %1715 = vmatprep.subr.bf16.mxu0 %v1898_v0  ;;  %1723 = vmatprep.subr.bf16.mxu1 %v1898_v0 }
  0x80   :  { %1717 = vmatprep.mubr.msk.bf16.mxu0 %vm1899_vm0, %v1898_v0  ;;  %1725 = vmatprep.mubr.msk.bf16.mxu1 %vm1899_vm0, %v1898_v0 }
  0x82   :  { %1716 = vmatpush3.bf16.msra.mxu0 %v1821_v19  ;;  %1724 = vmatpush3.bf16.msra.mxu1 %v1821_v19 }
  0x83   :  { %1729 = vmatprep.subr.bf16.mxu0 %v1898_v0  ;;  %1737 = vmatprep.subr.bf16.mxu1 %v1898_v0 }
  0x85   :  { %1718 = vmatmul.mubr.msk.bf16.vlgmr.msra.gmra.mrb[8].mxu0 %vm137_vm2, %v1097_v24  ;;  %1726 = vmatmul.mubr.msk.bf16.vlgmr.msra.gmra.mrb[8].mxu1 %vm137_vm2, %v1143_v25 }
  0x86   :  { %1730 = vmatpush3.bf16.msra.mxu0 %v1820_v2  ;;  %1738 = vmatpush3.bf16.msra.mxu1 %v1820_v2 }
  0x87   :  { %1731 = vmatprep.subr.bf16.mxu0 %v1898_v0  ;;  %1739 = vmatprep.subr.bf16.mxu1 %v1898_v0 }
  0x88   :  { %1733 = vmatprep.mubr.msk.bf16.mxu0 %vm1899_vm0, %v1898_v0  ;;  %1741 = vmatprep.mubr.msk.bf16.mxu1 %vm1899_vm0, %v1898_v0 }
  0x8a   :  { %1732 = vmatpush3.bf16.msra.mxu0 %v1821_v19  ;;  %1740 = vmatpush3.bf16.msra.mxu1 %v1821_v19 }
  0x8d   :  { %1734 = vmatmul.mubr.msk.bf16.vlgmr.msra.gmra.mrb[12].mxu0 %vm137_vm2, %v1189_v26  ;;  %1742 = vmatmul.mubr.msk.bf16.vlgmr.msra.gmra.mrb[12].mxu1 %vm137_vm2, %v1235_v27 }
 0x148   :  { %v951_v28 = vpop.f32.mrb[0].mxu0  ;;  %v997_v29 = vpop.f32.mrb[0].mxu1 }
 0x149   :  { %v1687_v30 = vpop.f32.mrb[1].mxu0  ;;  %v1695_v31 = vpop.f32.mrb[1].mxu1 }
 0x14a   :  { %v954_v32 = vpop.f32.mrb[2].mxu0  ;;  %v1000_v33 = vpop.f32.mrb[2].mxu1 }
 0x14b   :  { %v1297_v34 = vsel %vm1296_vm3, %v954_v32, -inf  ;;  %v1305_v0 = vsel %vm1296_vm3, %v1000_v33, -inf  ;;  %v1688_v35 = vpop.f32.mrb[3].mxu0  ;;  %v1696_v36 = vpop.f32.mrb[3].mxu1 }
 0x14c   :  { %v1298_v37 = vmax.f32 %v951_v28, %v1297_v34  ;;  %v1306_v38 = vmax.f32 %v997_v29, %v1305_v0 }
 0x14e   :  { %v1299_v39 = vrot.slane %v1298_v37, 4  ;;  %v1307_v40 = vrot.slane %v1306_v38, 4 }
 0x150   :  { %v1300_v41 = vmax.f32 %v1298_v37, %v1299_v39  ;;  %v1308_v42 = vmax.f32 %v1306_v38, %v1307_v40  ;;  %v1043_v43 = vpop.f32.mrb[4].mxu0  ;;  %v1089_v44 = vpop.f32.mrb[4].mxu1 }
 0x151   :  { %v1703_v45 = vpop.f32.mrb[5].mxu0  ;;  %v1711_v46 = vpop.f32.mrb[5].mxu1 }
 0x152   :  { %v1301_v47 = vrot.slane %v1300_v41, 2  ;;  %v1309_v48 = vrot.slane %v1308_v42, 2  ;;  %v1046_v49 = vpop.f32.mrb[6].mxu0  ;;  %v1092_v50 = vpop.f32.mrb[6].mxu1 }
 0x153   :  { %v1313_v51 = vsel %vm1296_vm3, %v1046_v49, -inf  ;;  %v1321_v52 = vsel %vm1296_vm3, %v1092_v50, -inf  ;;  %v1704_v53 = vpop.f32.mrb[7].mxu0  ;;  %v1712_v54 = vpop.f32.mrb[7].mxu1 }
 0x154   :  { %v1302_v55 = vmax.f32 %v1300_v41, %v1301_v47  ;;  %v1310_v56 = vmax.f32 %v1308_v42, %v1309_v48  ;;  %v1314_v57 = vmax.f32 %v1043_v43, %v1313_v51  ;;  %v1322_v58 = vmax.f32 %v1089_v44, %v1321_v52 }
 0x156   :  { %v1303_v59 = vrot.slane %v1302_v55, 1  ;;  %v1311_v60 = vrot.slane %v1310_v56, 1  ;;  %v1315_v61 = vrot.slane %v1314_v57, 4  ;;  %v1323_v62 = vrot.slane %v1322_v58, 4 }
 0x158   :  { %v1304_v3 = vmax.f32 %v1302_v55, %v1303_v59  ;;  %v1312_v4 = vmax.f32 %v1310_v56, %v1311_v60  ;;  %v1316_v5 = vmax.f32 %v1314_v57, %v1315_v61  ;;  %v1324_v6 = vmax.f32 %v1322_v58, %v1323_v62  ;;  %v1135_v7 = vpop.f32.mrb[8].mxu0  ;;  %v1181_v8 = vpop.f32.mrb[8].mxu1 }
 0x159   :  { %v1719_v9 = vpop.f32.mrb[9].mxu0  ;;  %v1727_v10 = vpop.f32.mrb[9].mxu1 }
 0x15a   :  { %v1368_v11 = vadd.f32 %v2156_v63, %v1304_v3  ;;  %v1369_v12 = vadd.f32 %v2156_v63, %v1312_v4  ;;  %v1317_v13 = vrot.slane %v1316_v5, 2  ;;  %v1325_v14 = vrot.slane %v1324_v6, 2  ;;  %v1138_v15 = vpop.f32.mrb[10].mxu0  ;;  %v1184_v16 = vpop.f32.mrb[10].mxu1 }
 0x15b   :  { %v1329_v17 = vsel %vm1296_vm3, %v1138_v15, -inf  ;;  %v1337_v18 = vsel %vm1296_vm3, %v1184_v16, -inf  ;;  %v1720_v1 = vpop.f32.mrb[11].mxu0  ;;  %v1728_v2 = vpop.f32.mrb[11].mxu1 }
 0x15c   :  { %v1377_v19 = vmax.f32 %v1369_v12, 0.0  ;;  %v1318_v20 = vmax.f32 %v1316_v5, %v1317_v13  ;;  %v1326_v21 = vmax.f32 %v1324_v6, %v1325_v14  ;;  %v1330_v22 = vmax.f32 %v1135_v7, %v1329_v17 }
 0x15d   :  { %v1338_v23 = vmax.f32 %v1181_v8, %v1337_v18  ;;  %v1376_v24 = vmax.f32 %v1368_v11, 0.0 }
 0x15e   :  { %v1392_v25 = vrot.slane %v1377_v19, 7  ;;  %v1319_v26 = vrot.slane %v1318_v20, 1  ;;  %v1327_v27 = vrot.slane %v1326_v21, 1  ;;  %v1331_v28 = vrot.slane %v1330_v22, 4 }
 0x15f   :  { %v1339_v29 = vrot.slane %v1338_v23, 4 }
 0x160   :  { %v1394_v30 = vsel %vm1393_vm4, %v1392_v25, %v1376_v24  ;;  %v1320_v31 = vmax.f32 %v1318_v20, %v1319_v26  ;;  %v1328_v32 = vmax.f32 %v1326_v21, %v1327_v27  ;;  %v1227_v33 = vpop.f32.mrb[12].mxu0  ;;  %v1273_v34 = vpop.f32.mrb[12].mxu1  ;;  %v1332_v0 = vmax.f32 %v1330_v22, %v1331_v28 }
 0x161   :  { %v1340_v35 = vmax.f32 %v1338_v23, %v1339_v29  ;;  %v1735_v36 = vpop.f32.mrb[13].mxu0  ;;  %v1743_v37 = vpop.f32.mrb[13].mxu1 }
 0x162   :  { %v1370_v38 = vadd.f32 %v2156_v63, %v1320_v31  ;;  %v1371_v39 = vadd.f32 %v2156_v63, %v1328_v32  ;;  %v1230_v40 = vpop.f32.mrb[14].mxu0  ;;  %v1276_v41 = vpop.f32.mrb[14].mxu1  ;;  %v1333_v42 = vrot.slane %v1332_v0, 2 }
 0x163   :  { %v1341_v43 = vrot.slane %v1340_v35, 2  ;;  %v1345_v44 = vsel %vm1296_vm3, %v1230_v40, -inf  ;;  %v1353_v45 = vsel %vm1296_vm3, %v1276_v41, -inf  ;;  %v1736_v46 = vpop.f32.mrb[15].mxu0  ;;  %v1744_v47 = vpop.f32.mrb[15].mxu1 }
 0x164   :  { %v1378_v48 = vmax.f32 %v1370_v38, 0.0  ;;  %v1379_v49 = vmax.f32 %v1371_v39, 0.0  ;;  %v1346_v50 = vmax.f32 %v1227_v33, %v1345_v44  ;;  %v1354_v51 = vmax.f32 %v1273_v34, %v1353_v45 }
 0x165   :  { %v1334_v52 = vmax.f32 %v1332_v0, %v1333_v42  ;;  %v1342_v53 = vmax.f32 %v1340_v35, %v1341_v43 }
 0x166   :  { %v1395_v54 = vrot.slane %v1378_v48, 6  ;;  %v1398_v55 = vrot.slane %v1379_v49, 5  ;;  %v1347_v56 = vrot.slane %v1346_v50, 4  ;;  %v1355_v57 = vrot.slane %v1354_v51, 4 }
 0x167   :  { %v1335_v58 = vrot.slane %v1334_v52, 1  ;;  %v1343_v59 = vrot.slane %v1342_v53, 1 }
 0x168   :  { %v1348_v60 = vmax.f32 %v1346_v50, %v1347_v56  ;;  %v1356_v61 = vmax.f32 %v1354_v51, %v1355_v57  ;;  %v1397_v62 = vsel %vm1396_vm5, %v1395_v54, %v1394_v30 }
 0x169   :  { %v1336_v3 = vmax.f32 %v1334_v52, %v1335_v58  ;;  %v1344_v4 = vmax.f32 %v1342_v53, %v1343_v59  ;;  %v1400_v5 = vsel %vm1399_vm6, %v1398_v55, %v1397_v62 }
 0x16a   :  { %v1349_v6 = vrot.slane %v1348_v60, 2  ;;  %v1357_v7 = vrot.slane %v1356_v61, 2 }
 0x16b   :  { %v1372_v8 = vadd.f32 %v2156_v63, %v1336_v3  ;;  %v1373_v9 = vadd.f32 %v2156_v63, %v1344_v4 }
 0x16c   :  { %v1350_v10 = vmax.f32 %v1348_v60, %v1349_v6  ;;  %v1358_v11 = vmax.f32 %v1356_v61, %v1357_v7 }
 0x16d   :  { %v1380_v12 = vmax.f32 %v1372_v8, 0.0  ;;  %v1381_v13 = vmax.f32 %v1373_v9, 0.0 }
 0x16e   :  { %v1351_v14 = vrot.slane %v1350_v10, 1  ;;  %v1359_v15 = vrot.slane %v1358_v11, 1 }
 0x16f   :  { %v1401_v16 = vrot.slane %v1380_v12, 4  ;;  %v1404_v17 = vrot.slane %v1381_v13, 3 }
 0x170   :  { %v1352_v18 = vmax.f32 %v1350_v10, %v1351_v14  ;;  %v1360_v1 = vmax.f32 %v1358_v11, %v1359_v15 }
 0x171   :  { %v1403_v2 = vsel %vm1402_vm7, %v1401_v16, %v1400_v5 }
 0x172   :  { %v1374_v19 = vadd.f32 %v2156_v63, %v1352_v18  ;;  %v1375_v20 = vadd.f32 %v2156_v63, %v1360_v1  ;;  %v1406_v21 = vsel %vm1405_vm8, %v1404_v17, %v1403_v2 }
 0x174   :  { %v1382_v22 = vmax.f32 %v1374_v19, 0.0  ;;  %v1383_v23 = vmax.f32 %v1375_v20, 0.0 }
 0x176   :  { %v1407_v24 = vrot.slane %v1382_v22, 2  ;;  %v1410_v25 = vrot.slane %v1383_v23, 1 }
 0x178   :  { %v1409_v26 = vsel %vm1408_vm9, %v1407_v24, %v1406_v21 }
 0x179   :  { %v1412_v27 = vsel %vm1411_vm10, %v1410_v25, %v1409_v26 }
 0x17a   :  { %1414 = vst [vmem:[#allocation7] sm:$0xff] %v1412_v27 }
 0x17b   :  { %1877 = shalt.err (!%p1874_p6)
}
 0x17c   :  { %s1878_s15 = scalar_lea.hbm %s2185_s3, 128 }
 0x17d   :  { %p1879_p7 = scmp.ne.s32.totalorder %s2185_s3, %s1878_s15  ;;  %p1882_p8 = scmp.lt.u32.totalorder %s1878_s15, %s2185_s3 }
 0x17f   :  { %p1884_p9 = pnand %p1882_p8, %p1879_p7 }
 0x181   :  { %1887 = shalt.err (!%p1884_p9)
}
 0x182   :  { %1424 = dma.vmem_to_hbm [thread:$0]  %s1422_s11, 128, %s2185_s3, [#allocation4]  }
 0x183   :  { %1892 = dma.done.wait [#allocation4], 128  }
 0x184   :  { %1893 = vsyncadd [#allocation4], 4294967168 }
 0x185   :  { %1428 = vsyncpa [#allocation3], 1 }
 0x186   :  { %1429 = vsyncpa [#allocation6], 1 }
 0x187   :  { %1430 = vsyncpa [#allocation4], 1 }

</bundles_post_ra>
